<compile_context>
chip_gen: v5e
topology: v5e:2x2
jax: 0.10.0
libtpu: 0.0.40
codegen_flags: <defaults>
</compile_context>

<pallas_src>
import functools

import jax
import jax.numpy as jnp
from jax.experimental import pallas as pl
from jax.experimental.pallas import tpu as pltpu

_NEG = -1e30  # finite "-inf" (Python float -> no captured-constant issue)


# --------------------------------------------------------------------------
# Kernels
# --------------------------------------------------------------------------
def attn_pool_simple_kernel(x_ref, w_ref, o_ref, *, seq_len, needs_mask):
    """Single sequence-tile path (block_s covers the whole padded sequence)."""
    x = x_ref[...]                                   # (BB, BS, H), native dtype
    w = w_ref[...]                                   # (1, H) f32

    # H->1 projection on the VPU (elementwise mul + lane reduce).  f32 math.
    scores = jnp.sum(x * w[None, :, :], axis=-1)     # (BB, BS), lane-dense in S

    if needs_mask:  # only emitted when the sequence axis was padded
        s_pos = jax.lax.broadcasted_iota(jnp.int32, scores.shape, 1)
        scores = jnp.where(s_pos < seq_len, scores, _NEG)

    m = jnp.max(scores, axis=-1, keepdims=True)      # (BB, 1)
    p = jnp.exp(scores - m)                          # (BB, BS)
    l = jnp.sum(p, axis=-1, keepdims=True)           # (BB, 1)
    inv_l = pl.reciprocal(l, approx=False)           # (BB, 1)

    # Weighted sum over S: the single MXU pass over the x tile, f32 accumulate.
    part = jnp.einsum("bqs,bsh->bqh", p[:, None, :].astype(x.dtype), x,
                      preferred_element_type=jnp.float32)       # (BB, 1, H)
    o_ref[...] = (part[:, 0, :] * inv_l).astype(o_ref.dtype)


def attn_pool_online_kernel(x_ref, w_ref, o_ref, m_sc, l_sc, acc_sc,
                            *, seq_len, block_s, needs_mask):
    """Flash-style online softmax over sequence tiles (long-S path)."""
    j = pl.program_id(1)

    @pl.when(j == 0)
    def _init():
        m_sc[...] = jnp.full_like(m_sc, _NEG)
        l_sc[...] = jnp.zeros_like(l_sc)
        acc_sc[...] = jnp.zeros_like(acc_sc)

    x = x_ref[...]                                   # (BB, BS, H)
    w = w_ref[...]                                   # (1, H) f32

    scores = jnp.sum(x * w[None, :, :], axis=-1)     # (BB, BS), lane-dense

    if needs_mask:
        # Only the last tile can be ragged; tiles always keep >= 1 valid
        # position so m_new never collapses to _NEG.
        s_pos = j * block_s + jax.lax.broadcasted_iota(jnp.int32, scores.shape, 1)
        scores = jnp.where(s_pos < seq_len, scores, _NEG)

    m_prev = m_sc[...]                                           # (BB, 1)
    m_new = jnp.maximum(m_prev, jnp.max(scores, axis=-1, keepdims=True))
    alpha = jnp.exp(m_prev - m_new)                              # (BB, 1)
    p = jnp.exp(scores - m_new)                                  # (BB, BS)

    l_sc[...] = alpha * l_sc[...] + jnp.sum(p, axis=-1, keepdims=True)

    part = jnp.einsum("bqs,bsh->bqh", p[:, None, :].astype(x.dtype), x,
                      preferred_element_type=jnp.float32)        # (BB, 1, H)
    acc_sc[...] = alpha * acc_sc[...] + part[:, 0, :]
    m_sc[...] = m_new

    @pl.when(j == pl.num_programs(1) - 1)
    def _finalize():
        inv_l = pl.reciprocal(l_sc[...], approx=False)           # (BB, 1)
        o_ref[...] = (acc_sc[...] * inv_l).astype(o_ref.dtype)


# --------------------------------------------------------------------------
# Tiling / VMEM sizing
# --------------------------------------------------------------------------
def _vmem_capacity():
    try:
        return int(pltpu.get_tpu_info().vmem_capacity_bytes)
    except Exception:
        return 128 * 1024 * 1024


def _default_x_block_budget():
    cap = _vmem_capacity()
    # v7x: 64 MiB/TC -> keep x tiles <= 8 MiB; v5e/v6e: 128 MiB -> go bigger.
    return 8 * 1024 * 1024 if cap <= 64 * 1024 * 1024 else 24 * 1024 * 1024


def _choose_blocks(B, S, H, itemsize, budget):
    """Pick (block_b, block_s).

    block_b is a multiple of 8 (sublane-dense output stores).  block_s == S in
    the common case; otherwise it is a multiple of 128 (lane-dense scores and
    bf16/int8 sublane packing of the x tile).
    """
    Bp0 = ((B + 7) // 8) * 8
    b_cap = min(Bp0, 128)
    row_bytes = S * H * itemsize
    block_b = max(8, min(b_cap, ((budget // max(row_bytes, 1)) // 8) * 8))
    if block_b * row_bytes <= budget:
        # Keep >= 2 steps on the "parallel" batch axis when possible (v7x 2 TCs).
        if block_b >= Bp0 and Bp0 >= 16:
            block_b = max(8, ((Bp0 // 2) // 8) * 8)
        return block_b, S
    # Long-sequence path: tile S in 128-multiples.
    block_b = 8
    block_s = (budget // (block_b * H * itemsize)) // 128 * 128
    block_s = max(128, block_s)
    block_s = min(block_s, ((S + 127) // 128) * 128)
    return block_b, block_s


def _vmem_limit(block_b, block_s, H, itemsize, single_tile):
    x_blk = block_b * block_s * H * itemsize
    out_blk = block_b * H * itemsize
    w_bytes = H * 4
    scratch = 0 if single_tile else block_b * (H + 2) * 4
    need = 2 * x_blk + 2 * out_blk + 2 * w_bytes + scratch
    limit = int(need * 1.25) + (1 << 20)          # +25% headroom + internal scratch
    limit = max(limit, 16 * 1024 * 1024)
    cap = _vmem_capacity()
    return min(limit, (cap * 7) // 8)


# --------------------------------------------------------------------------
# Wrapper
# --------------------------------------------------------------------------
def attention_pooling(x, w, b=None, *, x_block_budget_bytes=None,
                      vmem_limit_bytes=None):
    """AttentionPooling forward.

    x: (B, S, H); w: (1, H) (torch nn.Linear(H, 1) weight layout) or (H,).
    b: ignored — softmax is shift-invariant along S, so the scalar bias has no
    effect on the output (exact, not an approximation).  Returns (B, H).
    """
    del b
    B, S, H = x.shape
    itemsize = jnp.dtype(x.dtype).itemsize

    if x_block_budget_bytes is None:
        x_block_budget_bytes = _default_x_block_budget()

    block_b, block_s = _choose_blocks(B, S, H, itemsize, x_block_budget_bytes)

    Bp = pl.cdiv(B, block_b) * block_b
    Sp = pl.cdiv(S, block_s) * block_s
    if (Bp, Sp) != (B, S):
        # Zero padding; padded S positions are masked in-kernel, padded batch
        # rows are benign (uniform softmax over zero rows) and sliced off below.
        x = jnp.pad(x, ((0, Bp - B), (0, Sp - S), (0, 0)))

    w = jnp.asarray(w).reshape(1, H).astype(jnp.float32)

    single_tile = (Sp == block_s)
    needs_mask = (Sp != S)

    if vmem_limit_bytes is None:
        vmem_limit_bytes = _vmem_limit(block_b, block_s, H, itemsize, single_tile)

    if single_tile:
        grid = (Bp // block_b,)
        kernel = functools.partial(attn_pool_simple_kernel,
                                   seq_len=S, needs_mask=needs_mask)
        out = pl.pallas_call(
            kernel,
            out_shape=jax.ShapeDtypeStruct((Bp, H), x.dtype),
            grid_spec=pltpu.PrefetchScalarGridSpec(
                num_scalar_prefetch=0,
                grid=grid,
                in_specs=[
                    pl.BlockSpec((block_b, block_s, H), lambda i: (i, 0, 0)),
                    pl.BlockSpec((1, H), lambda i: (0, 0)),
                ],
                out_specs=pl.BlockSpec((block_b, H), lambda i: (i, 0)),
            ),
            compiler_params=pltpu.CompilerParams(
                dimension_semantics=("parallel",),
                vmem_limit_bytes=int(vmem_limit_bytes),
            ),
        )(x, w)
    else:
        grid = (Bp // block_b, Sp // block_s)
        kernel = functools.partial(attn_pool_online_kernel,
                                   seq_len=S, block_s=block_s,
                                   needs_mask=needs_mask)
        out = pl.pallas_call(
            kernel,
            out_shape=jax.ShapeDtypeStruct((Bp, H), x.dtype),
            grid_spec=pltpu.PrefetchScalarGridSpec(
                num_scalar_prefetch=0,
                grid=grid,
                in_specs=[
                    pl.BlockSpec((block_b, block_s, H), lambda i, j: (i, j, 0)),
                    pl.BlockSpec((1, H), lambda i, j: (0, 0)),
                ],
                out_specs=pl.BlockSpec((block_b, H), lambda i, j: (i, 0)),
                scratch_shapes=[
                    pltpu.VMEM((block_b, 1), jnp.float32),   # running max
                    pltpu.VMEM((block_b, 1), jnp.float32),   # running denom
                    pltpu.VMEM((block_b, H), jnp.float32),   # running weighted sum
                ],
            ),
            compiler_params=pltpu.CompilerParams(
                dimension_semantics=("parallel", "arbitrary"),
                vmem_limit_bytes=int(vmem_limit_bytes),
            ),
        )(x, w)

    return out[:B]


# --------------------------------------------------------------------------
# Reference (matches the torch module, bias included)
# --------------------------------------------------------------------------
def attention_pooling_ref(x, w, b):
    scores = jnp.einsum("bsh,qh->bsq", x, w) + b[None, None, :]   # (B, S, 1)
    attn_w = jax.nn.softmax(scores, axis=1)
    return jnp.sum(x * attn_w, axis=1)


if __name__ == "__main__":
    key = jax.random.PRNGKey(0)
    B, S, H = 2, 8, 32

    kx, kw, kb = jax.random.split(key, 3)
    x = jax.random.normal(kx, (B, S, H), dtype=jnp.float32)
    # nn.Linear(hidden_dim, 1): weight (1, H), bias (1,).
    bound = 1.0 / (H ** 0.5)
    w = jax.random.uniform(kw, (1, H), minval=-bound, maxval=bound,
                           dtype=jnp.float32)
    b = jax.random.uniform(kb, (1,), minval=-bound, maxval=bound,
                           dtype=jnp.float32)

    out = attention_pooling(x, w, b)
    out = jax.block_until_ready(out)

    ref = attention_pooling_ref(x, w, b)
    assert out.shape == (B, H)
    assert jnp.allclose(out, ref, atol=1e-5, rtol=1e-5), \
        float(jnp.max(jnp.abs(out - ref)))

    print("KERNEL_OK")
</pallas_src>

<mosaic_0001>
module attributes {stable_mosaic.version = 11 : i64} {
  func.func @attn_pool_simple_kernel(%arg0: i32, %arg1: memref<8x8x32xf32, #tpu.memory_space<vmem>>, %arg2: memref<1x32xf32, #tpu.memory_space<vmem>>, %arg3: memref<8x32xf32, #tpu.memory_space<vmem>>) attributes {dimension_semantics = [#tpu.dimension_semantics<parallel>], iteration_bounds = array<i64: 1>, scalar_prefetch = 0 : i64, scratch_operands = 0 : i64, tpu.core_type = #tpu.core_type<tc>, window_params = [{transform_indices = @transform_0, window_bounds = array<i64: 8, 8, 32>}, {pipeline_mode = #tpu.pipeline_mode<synchronous>, transform_indices = @transform_1, window_bounds = array<i64: 1, 32>}, {transform_indices = @transform_2, window_bounds = array<i64: 8, 32>}]} {
    %c0 = arith.constant 0 : index
    %c0_0 = arith.constant 0 : index
    %c0_1 = arith.constant 0 : index
    %0 = vector.load %arg1[%c0, %c0_0, %c0_1] : memref<8x8x32xf32, #tpu.memory_space<vmem>>, vector<8x8x32xf32>
    %c0_2 = arith.constant 0 : index
    %c0_3 = arith.constant 0 : index
    %1 = vector.load %arg2[%c0_2, %c0_3] : memref<1x32xf32, #tpu.memory_space<vmem>>, vector<1x32xf32>
    %2 = vector.shape_cast %1 : vector<1x32xf32> to vector<1x1x32xf32>
    %3 = vector.broadcast %2 : vector<1x1x32xf32> to vector<8x8x32xf32>
    %4 = arith.mulf %0, %3 : vector<8x8x32xf32>
    %cst = arith.constant dense<0.000000e+00> : vector<8x8xf32>
    %5 = vector.multi_reduction <add>, %4, %cst [2] : vector<8x8x32xf32> to vector<8x8xf32>
    %cst_4 = arith.constant dense<0xFF800000> : vector<8xf32>
    %6 = vector.multi_reduction <maximumf>, %5, %cst_4 [1] : vector<8x8xf32> to vector<8xf32>
    %7 = vector.shape_cast %6 : vector<8xf32> to vector<8x1xf32>
    %8 = vector.broadcast %7 : vector<8x1xf32> to vector<8x8xf32>
    %9 = arith.subf %5, %8 : vector<8x8xf32>
    %10 = math.exp %9 : vector<8x8xf32>
    %cst_5 = arith.constant dense<0.000000e+00> : vector<8xf32>
    %11 = vector.multi_reduction <add>, %10, %cst_5 [1] : vector<8x8xf32> to vector<8xf32>
    %12 = vector.shape_cast %11 : vector<8xf32> to vector<8x1xf32>
    %13 = tpu.reciprocal %12 : vector<8x1xf32> -> vector<8x1xf32>
    %14 = vector.shape_cast %10 : vector<8x8xf32> to vector<8x1x8xf32>
    "tpu.trace_start"() <{level = 10 : i32, message = "bqs,bsh->bqh"}> : () -> ()
    %cst_6 = arith.constant dense<0.000000e+00> : vector<8x1x32xf32>
    %15 = tpu.matmul %14, %0, %cst_6 {dimension_numbers = #tpu.dot_dimension_numbers<[2], [1], [1], [2], [0, 0, 0, 1, 1, 2], [0], [0]>} : vector<8x1x8xf32>, vector<8x8x32xf32>, vector<8x1x32xf32> -> vector<8x1x32xf32>
    "tpu.trace_stop"() : () -> ()
    %16 = vector.shape_cast %15 : vector<8x1x32xf32> to vector<8x32xf32>
    %17 = vector.broadcast %13 : vector<8x1xf32> to vector<8x32xf32>
    %18 = arith.mulf %16, %17 : vector<8x32xf32>
    %c0_7 = arith.constant 0 : index
    %c0_8 = arith.constant 0 : index
    %19 = vector.load %arg3[%c0_7, %c0_8] : memref<8x32xf32, #tpu.memory_space<vmem>>, vector<8x32xf32>
    tpu.vector_store %arg3[%c0_7, %c0_8], %18 {strides = array<i32>} : memref<8x32xf32, #tpu.memory_space<vmem>>, vector<8x32xf32>,
    return
  }
  func.func @transform_0(%arg0: i32) -> (i32, i32, i32) {
    %c0_i32 = arith.constant 0 : i32
    %c0_i32_0 = arith.constant 0 : i32
    %c0_i32_1 = arith.constant 0 : i32
    return %arg0, %c0_i32, %c0_i32_0 : i32, i32, i32
  }
  func.func @transform_1(%arg0: i32) -> (i32, i32) {
    %c0_i32 = arith.constant 0 : i32
    %c0_i32_0 = arith.constant 0 : i32
    %c0_i32_1 = arith.constant 0 : i32
    return %c0_i32, %c0_i32_0 : i32, i32
  }
  func.func @transform_2(%arg0: i32) -> (i32, i32) {
    %c0_i32 = arith.constant 0 : i32
    %c0_i32_0 = arith.constant 0 : i32
    return %arg0, %c0_i32 : i32, i32
  }
}

</mosaic_0001>

<bundles_post_ra>
// kernel: tpu_custom_call.1
= control target key start
LH: loop header
LB: loop body
LE: loop exit
PB: predicated region body
PF: predicated region fallthrough
CT: control target
= control target key end

     0   :  { %7 = vsyncpa [#allocation3], 0  ;;  %s678_s0 = inlined_call_operand.hbm [shape: f32[8,8,32], index: 0, kind: input, shape index: {}]   ;;  %s679_s1 = inlined_call_operand.hbm [shape: f32[1,32], index: 1, kind: input, shape index: {}]   ;;  %s680_s2 = inlined_call_operand.hbm [shape: f32[8,32], index: 2, kind: output, shape index: {}]  }
   0x1   :  { %8 = vsyncpa [#allocation6], 0 }
   0x2   :  { %9 = vsyncpa [#allocation4], 0  ;;  %s14_s11 = sshll.u32 %s678_s0, 4  ;;  %s586_s12 = smov [#allocation2]   ;;  %s15_s11 = int_to_ptr.hbm [resolvable:$true] %s14_s11 }
   0x3   :  { %s16_s13 = sshll.u32 %s586_s12, 4  ;;  %s28_s16 = sshll.u32 %s679_s1, 4  ;;  %s17_s13 = int_to_ptr.vmem [resolvable:$true] %s16_s13  ;;  %s29_s16 = int_to_ptr.hbm [resolvable:$true] %s28_s16 }
   0x4   :  { %s587_s17 = smov 128   ;;  %s588_s18 = smov 8  }
   0x5   :  { %22 = dma.hbm_to_vmem [thread:$0]  %s15_s11, 1024, %s17_s13, [#allocation3], %s587_s17, %s587_s17, %s588_s18  }
   0x6   :  { %s589_s19 = smov [#allocation5]  }
   0x7   :  { %s30_s20 = sshll.u32 %s589_s19, 4  ;;  %s31_s20 = int_to_ptr.vmem [resolvable:$true] %s30_s20 }
   0x8   :  { %33 = dma.hbm_to_vmem [thread:$0]  %s29_s16, 16, %s31_s20, [#allocation6]  }
   0x9   :  { %580 = dma.done.wait [#allocation3], 1024  }
   0xa   :  { %581 = vsyncadd [#allocation3], 4294966272 }
   0xb   :  { %582 = dma.done.wait [#allocation6], 16  }
   0xc   :  { %583 = vsyncadd [#allocation6], 4294967280  ;;  %v42_v0 = vld [vmem:[#allocation2] sm:$0xff]  ;;  %vm62_vm0 = vcmask 261120   ;;  %v44_v2 = vld [vmem:[#allocation2 + $0x10] sm:$0xff]  ;;  %v95_v27 = vlaneseq  ;;  %vm105_vm1 = vcmask 1041409  }
   0xd   :  { %v489_v1 = vld [vmem:[#allocation5] ss:$0 sm:$0xff]  ;;  %v43_v4 = vld [vmem:[#allocation2 + $0x8] sm:$0xff]  ;;  %247 = vmatpush.msra.mxu0 %v42_v0  ;;  %v45_v8 = vld [vmem:[#allocation2 + $0x18] sm:$0xff]  ;;  %291 = vmatpush.msra.mxu2 %v44_v2  ;;  %vm107_vm2 = vcmask 1042434   ;;  %vm109_vm3 = vcmask 1043459  }
   0xe   :  { %v46_v3 = vld [vmem:[#allocation2 + $0x20] sm:$0xff]  ;;  %v54_v5 = vmul.f32 %v489_v1, %v42_v0  ;;  %v56_v6 = vmul.f32 %v489_v1, %v44_v2  ;;  %269 = vmatpush.msra.mxu1 %v43_v4  ;;  %v47_v9 = vld [vmem:[#allocation2 + $0x28] sm:$0xff]  ;;  %v48_v10 = vld [vmem:[#allocation2 + $0x30] sm:$0xff]  ;;  %313 = vmatpush.msra.mxu3 %v45_v8  ;;  %v55_v15 = vmul.f32 %v489_v1, %v43_v4  ;;  %v623_v29 = vand.u32 127, %v95_v27  ;;  %s591_s0 = smov [#allocation7]   ;;  %s461_s23 = sshll.u32 %s680_s2, 4  ;;  %s462_s23 = int_to_ptr.hbm [resolvable:$true] %s461_s23 }
   0xf   :  { %v58_v7 = vmul.f32 %v489_v1, %v46_v3  ;;  %379 = vmatpush.msrb.mxu2 %v48_v10  ;;  %v49_v14 = vld [vmem:[#allocation2 + $0x38] sm:$0xff]  ;;  %v57_v16 = vmul.f32 %v489_v1, %v45_v8  ;;  %v59_v17 = vmul.f32 %v489_v1, %v47_v9  ;;  %335 = vmatpush.msrb.mxu0 %v46_v3  ;;  %vm111_vm4 = vcmask 1044484   ;;  %s459_s1 = sshll.u32 %s591_s0, 4  ;;  %s460_s1 = int_to_ptr.vmem [resolvable:$true] %s459_s1 }
  0x10   :  { %v63_v11 = vsel %vm62_vm0, %v54_v5, 0.0  ;;  %v69_v12 = vsel %vm62_vm0, %v56_v6, 0.0  ;;  %357 = vmatpush.msrb.mxu1 %v47_v9  ;;  %401 = vmatpush.msrb.mxu3 %v49_v14  ;;  %v66_v18 = vsel %vm62_vm0, %v55_v15, 0.0  ;;  %v60_v21 = vmul.f32 %v489_v1, %v48_v10 }
  0x11   :  { %v75_v13 = vsel %vm62_vm0, %v58_v7, 0.0  ;;  %64 = vadd.xlane.f32.xlu0 %v63_v11  ;;  %70 = vadd.xlane.f32.xlu1 %v69_v12  ;;  %v72_v19 = vsel %vm62_vm0, %v57_v16, 0.0  ;;  %v78_v20 = vsel %vm62_vm0, %v59_v17, 0.0  ;;  %v61_v22 = vmul.f32 %v489_v1, %v49_v14 }
  0x12   :  { %76 = vadd.xlane.f32.xlu2 %v75_v13  ;;  %v81_v23 = vsel %vm62_vm0, %v60_v21, 0.0  ;;  %vm113_vm5 = vcmask 1045509   ;;  %vm115_vm6 = vcmask 1046534   ;;  %vm117_vm7 = vcmask 1047559  }
  0x13   :  { %v84_v24 = vsel %vm62_vm0, %v61_v22, 0.0  ;;  %vm120_vm8 = vcmask 64512   ;;  %v590_v51 = vmov 0  }
  0x14   :  { %488 = vset.pattern.permute.xlu2 %v590_v51  ;;  %487 = vset.pattern.permute.xlu1 %v590_v51 }
  0x15   :  { %486 = vset.pattern.permute.xlu0 %v590_v51 }
  0x19   :  { %67 = vadd.xlane.f32.xlu0 %v66_v18  ;;  %73 = vadd.xlane.f32.xlu1 %v72_v19 }
  0x1a   :  { %79 = vadd.xlane.f32.xlu2 %v78_v20 }
  0x21   :  { %82 = vadd.xlane.f32.xlu0 %v81_v23  ;;  %85 = vadd.xlane.f32.xlu1 %v84_v24 }
  0x84   :  { %v65_v25 = vpop.xlane.xlu0 %64  ;;  %v71_v26 = vpop.xlane.xlu1 %70 }
  0x85   :  { %v621_v28 = vpop.xlane.xlu2 %76  ;;  %v97_v32 = vperm.slane %v65_v25, %v623_v29  ;;  %v99_v35 = vperm.slane %v71_v26, %v623_v29 }
  0x86   :  { %v101_v39 = vperm.slane %v621_v28, %v623_v29 }
  0x8c   :  { %v68_v30 = vpop.xlane.xlu0 %67  ;;  %v74_v31 = vpop.xlane.xlu1 %73 }
  0x8d   :  { %v98_v33 = vperm.slane %v68_v30, %v623_v29  ;;  %v100_v34 = vperm.slane %v74_v31, %v623_v29  ;;  %v80_v37 = vpop.xlane.xlu2 %79 }
  0x8e   :  { %v102_v41 = vperm.slane %v80_v37, %v623_v29 }
  0x8f   :  { %v106_v36 = vsel %vm105_vm1, %v98_v33, %v97_v32 }
  0x90   :  { %v108_v38 = vsel %vm107_vm2, %v99_v35, %v106_v36 }
  0x91   :  { %v110_v40 = vsel %vm109_vm3, %v100_v34, %v108_v38 }
  0x92   :  { %v112_v42 = vsel %vm111_vm4, %v101_v39, %v110_v40 }
  0x93   :  { %v114_v47 = vsel %vm113_vm5, %v102_v41, %v112_v42 }
  0x94   :  { %v83_v43 = vpop.xlane.xlu0 %82  ;;  %v86_v44 = vpop.xlane.xlu1 %85 }
  0x95   :  { %v103_v45 = vperm.slane %v83_v43, %v623_v29  ;;  %v104_v46 = vperm.slane %v86_v44, %v623_v29 }
  0x97   :  { %v116_v48 = vsel %vm115_vm6, %v103_v45, %v114_v47 }
  0x98   :  { %v118_v49 = vsel %vm117_vm7, %v104_v46, %v116_v48 }
  0x99   :  { %v121_v50 = vsel %vm120_vm8, %v118_v49, -inf }
  0x9a   :  { %122 = vmax.xlane.f32.xlu2 %v121_v50 }
 0x10d   :  { %v123_v52 = vpop.xlane.xlu2 %122 }
 0x10e   :  { %v128_v53 = vperm.slane %v123_v52, 3  ;;  %v127_v54 = vperm.slane %v123_v52, 2  ;;  %v125_v55 = vperm.slane %v123_v52, 0  ;;  %v131_v59 = vperm.slane %v123_v52, 6 }
 0x10f   :  { %v130_v60 = vperm.slane %v123_v52, 5  ;;  %v126_v61 = vperm.slane %v123_v52, 1  ;;  %v129_v5 = vperm.slane %v123_v52, 4  ;;  %v132_v9 = vperm.slane %v123_v52, 7 }
 0x110   :  { %v144_v56 = vsub.f32 %v74_v31, %v128_v53  ;;  %v143_v57 = vsub.f32 %v71_v26, %v127_v54  ;;  %v141_v58 = vsub.f32 %v65_v25, %v125_v55  ;;  %v147_v1 = vsub.f32 %v83_v43, %v131_v59 }
 0x111   :  { %v146_v2 = vsub.f32 %v80_v37, %v130_v60  ;;  %v142_v3 = vsub.f32 %v68_v30, %v126_v61  ;;  %v145_v12 = vsub.f32 %v621_v28, %v129_v5  ;;  %v148_v13 = vsub.f32 %v86_v44, %v132_v9 }
 0x112   :  { %v155_v62 = vmul.f32 1.442695, %v144_v56  ;;  %v153_v63 = vmul.f32 1.442695, %v143_v57  ;;  %v149_v0 = vmul.f32 1.442695, %v141_v58 }
 0x113   :  { %v161_v4 = vmul.f32 1.442695, %v147_v1  ;;  %v159_v6 = vmul.f32 1.442695, %v146_v2  ;;  %v151_v8 = vmul.f32 1.442695, %v142_v3 }
 0x114   :  { %490 = vpow2.f32 %v155_v62  ;;  %v157_v14 = vmul.f32 1.442695, %v145_v12  ;;  %v163_v16 = vmul.f32 1.442695, %v148_v13 }
 0x115   :  { %492 = vpow2.f32 %v153_v63 }
 0x116   :  { %494 = vpow2.f32 %v149_v0 }
 0x117   :  { %496 = vpow2.f32 %v161_v4 }
 0x118   :  { %498 = vpow2.f32 %v159_v6 }
 0x119   :  { %500 = vpow2.f32 %v151_v8 }
 0x11a   :  { %v491_v7 = vpop.eup %490  ;;  %502 = vpow2.f32 %v157_v14 }
 0x11b   :  { %v493_v10 = vpop.eup %492  ;;  %183 = vperm.xlu1 %487, %v491_v7   ;;  %504 = vpow2.f32 %v163_v16 }
 0x11c   :  { %v495_v11 = vpop.eup %494  ;;  %180 = vperm.xlu0 %486, %v493_v10  }
 0x11d   :  { %174 = vperm.xlu2 %488, %v495_v11   ;;  %v497_v15 = vpop.eup %496 }
 0x11e   :  { %v499_v17 = vpop.eup %498 }
 0x11f   :  { %v501_v18 = vpop.eup %500 }
 0x120   :  { %v503_v19 = vpop.eup %502 }
 0x121   :  { %v505_v20 = vpop.eup %504 }
 0x123   :  { %192 = vperm.xlu1 %487, %v497_v15  }
 0x124   :  { %189 = vperm.xlu0 %486, %v499_v17  }
 0x125   :  { %177 = vperm.xlu2 %488, %v501_v18  }
 0x12b   :  { %186 = vperm.xlu1 %487, %v503_v19  }
 0x12d   :  { %195 = vperm.xlu2 %488, %v505_v20  }
 0x177   :  { %v175_v21 = vpop.permute.xlu2 %174 }
 0x178   :  { %v197_v22 = vperm.slane %v175_v21, %v623_v29 }
 0x17a   :  { %472 = vmatmul.msk.f32.vlgmr.msra.gmra.mxu0 %vm120_vm8, %v197_v22 }
 0x17f   :  { %v178_v23 = vpop.permute.xlu2 %177 }
 0x180   :  { %v198_v24 = vperm.slane %v178_v23, %v623_v29 }
 0x182   :  { %473 = vmatmul.msk.f32.vlgmr.msra.gmra.mxu1 %vm120_vm8, %v198_v24  ;;  %v205_v36 = vsel %vm105_vm1, %v198_v24, %v197_v22 }
 0x187   :  { %v196_v30 = vpop.permute.xlu2 %195 }
 0x188   :  { %v204_v32 = vperm.slane %v196_v30, %v623_v29 }
 0x18d   :  { %v184_v25 = vpop.permute.xlu1 %183 }
 0x18e   :  { %v200_v26 = vperm.slane %v184_v25, %v623_v29  ;;  %v181_v27 = vpop.permute.xlu0 %180 }
 0x18f   :  { %v199_v28 = vperm.slane %v181_v27, %v623_v29 }
 0x190   :  { %475 = vmatmul.msk.f32.vlgmr.msra.gmra.mxu3 %vm120_vm8, %v200_v26 }
 0x191   :  { %474 = vmatmul.msk.f32.vlgmr.msra.gmra.mxu2 %vm120_vm8, %v199_v28  ;;  %v206_v37 = vsel %vm107_vm2, %v199_v28, %v205_v36 }
 0x192   :  { %v207_v40 = vsel %vm109_vm3, %v200_v26, %v206_v37 }
 0x195   :  { %v193_v31 = vpop.permute.xlu1 %192 }
 0x196   :  { %v203_v33 = vperm.slane %v193_v31, %v623_v29  ;;  %v190_v34 = vpop.permute.xlu0 %189 }
 0x197   :  { %v202_v35 = vperm.slane %v190_v34, %v623_v29 }
 0x198   :  { %479 = vmatmul.msk.f32.vlgmr.msrb.gmra.mxu3 %vm120_vm8, %v204_v32 }
 0x199   :  { %477 = vmatmul.msk.f32.vlgmr.msrb.gmra.mxu1 %vm120_vm8, %v202_v35  ;;  %478 = vmatmul.msk.f32.vlgmr.msrb.gmra.mxu2 %vm120_vm8, %v203_v33 }
 0x19d   :  { %v187_v38 = vpop.permute.xlu1 %186 }
 0x19e   :  { %v201_v39 = vperm.slane %v187_v38, %v623_v29 }
 0x1a0   :  { %v208_v41 = vsel %vm111_vm4, %v201_v39, %v207_v40  ;;  %476 = vmatmul.msk.f32.vlgmr.msrb.gmra.mxu0 %vm120_vm8, %v201_v39 }
 0x1a1   :  { %v209_v42 = vsel %vm113_vm5, %v202_v35, %v208_v41 }
 0x1a2   :  { %v210_v43 = vsel %vm115_vm6, %v203_v33, %v209_v42 }
 0x1a3   :  { %v211_v44 = vsel %vm117_vm7, %v204_v32, %v210_v43 }
 0x1a4   :  { %v213_v45 = vsel %vm120_vm8, %v211_v44, 0.0 }
 0x1a5   :  { %214 = vadd.xlane.f32.xlu2 %v213_v45 }
 0x1f7   :  { %v249_v50 = vpop.f32.mrf.mxu0 }
 0x1ff   :  { %v271_v54 = vpop.f32.mrf.mxu1 }
 0x213   :  { %v315_v55 = vpop.f32.mrf.mxu3 }
 0x214   :  { %v293_v51 = vpop.f32.mrf.mxu2 }
 0x216   :  { %v359_v6 = vpop.f32.mrf.mxu1 }
 0x218   :  { %v215_v46 = vpop.xlane.xlu2 %214 }
 0x219   :  { %506 = vrcp.f32 %v215_v46  ;;  %v227_v49 = vand.u32 2147483648, %v215_v46  ;;  %v225_v53 = vand.u32 2147483647, %v215_v46  ;;  %vm221_vm10 = vweird.f32 %v215_v46 }
 0x21b   :  { %v228_v57 = vor.u32 1.1754944e-38, %v227_v49  ;;  %vm226_vm12 = vcmp.eq.f32.partialorder %v225_v53, 8.507059e+37  ;;  %v403_v15 = vpop.f32.mrf.mxu3 }
 0x21c   :  { %v381_v9 = vpop.f32.mrf.mxu2 }
 0x21d   :  { %v337_v3 = vpop.f32.mrf.mxu0 }
 0x21f   :  { %v507_v47 = vpop.eup %506 }
 0x220   :  { %v217_v48 = vmul.f32 %v507_v47, %v215_v46  ;;  %vm222_vm9 = vweird.f32 %v507_v47 }
 0x221   :  { %vm223_vm11 = vmor %vm221_vm10, %vm222_vm9 }
 0x222   :  { %v218_v29 = vsub.f32 1.0, %v217_v48 }
 0x224   :  { %v219_v52 = vmul.f32 %v507_v47, %v218_v29 }
 0x226   :  { %v220_v56 = vadd.f32 %v507_v47, %v219_v52 }
 0x228   :  { %v224_v58 = vsel %vm223_vm11, %v507_v47, %v220_v56 }
 0x229   :  { %v229_v59 = vsel %vm226_vm12, %v228_v57, %v224_v58 }
 0x22a   :  { %v407_v60 = vrot.slane %v229_v59, 1  ;;  %v408_v61 = vrot.slane %v229_v59, 2  ;;  %v412_v62 = vrot.slane %v229_v59, 6  ;;  %v409_v63 = vrot.slane %v229_v59, 3 }
 0x22b   :  { %v410_v0 = vrot.slane %v229_v59, 4  ;;  %v411_v1 = vrot.slane %v229_v59, 5  ;;  %v413_v2 = vrot.slane %v229_v59, 7  ;;  %v422_v10 = vmul.f32 %v249_v50, %v229_v59 }
 0x22c   :  { %v423_v4 = vmul.f32 %v407_v60, %v271_v54  ;;  %v424_v5 = vmul.f32 %v408_v61, %v293_v51  ;;  %v425_v7 = vmul.f32 %v409_v63, %v315_v55  ;;  %v428_v14 = vmul.f32 %v412_v62, %v381_v9 }
 0x22d   :  { %v426_v8 = vmul.f32 %v410_v0, %v337_v3  ;;  %v427_v11 = vmul.f32 %v411_v1, %v359_v6  ;;  %v429_v16 = vmul.f32 %v413_v2, %v403_v15 }
 0x22e   :  { %v438_v12 = vrot.slane %v423_v4, 7  ;;  %v440_v13 = vrot.slane %v424_v5, 6  ;;  %v442_v18 = vrot.slane %v425_v7, 5  ;;  %v448_v23 = vrot.slane %v428_v14, 2 }
 0x22f   :  { %v444_v20 = vrot.slane %v426_v8, 4  ;;  %v446_v22 = vrot.slane %v427_v11, 3  ;;  %v450_v25 = vrot.slane %v429_v16, 1 }
 0x230   :  { %v439_v17 = vsel %vm105_vm1, %v438_v12, %v422_v10 }
 0x231   :  { %v441_v19 = vsel %vm107_vm2, %v440_v13, %v439_v17 }
 0x232   :  { %v443_v21 = vsel %vm109_vm3, %v442_v18, %v441_v19 }
 0x233   :  { %v445_v24 = vsel %vm111_vm4, %v444_v20, %v443_v21 }
 0x234   :  { %v447_v26 = vsel %vm113_vm5, %v446_v22, %v445_v24 }
 0x235   :  { %v449_v27 = vsel %vm115_vm6, %v448_v23, %v447_v26 }
 0x236   :  { %v451_v28 = vsel %vm117_vm7, %v450_v25, %v449_v27 }
 0x237   :  { %453 = vst.msk [vmem:[#allocation7] sm:$0xff] %vm62_vm0, %v451_v28 }
 0x238   :  { %464 = dma.vmem_to_hbm [thread:$0]  %s460_s1, 128, %s462_s23, [#allocation4]  }
 0x239   :  { %584 = dma.done.wait [#allocation4], 128  }
 0x23a   :  { %585 = vsyncadd [#allocation4], 4294967168 }
 0x23b   :  { %469 = vsyncpa [#allocation3], 1 }
 0x23c   :  { %470 = vsyncpa [#allocation6], 1 }
 0x23d   :  { %471 = vsyncpa [#allocation4], 1 }

</bundles_post_ra>
